<compile_context>
chip_gen: v7x
topology: tpu7x:2x2x1
jax: 0.10.0
libtpu: 0.0.40
codegen_flags: <defaults>
</compile_context>

<pallas_src>
import functools
import math

import jax
import jax.numpy as jnp
from jax.experimental import pallas as pl
from jax.experimental.pallas import tpu as pltpu

LANES = 128
SUBLANES = 8
MIN_BLOCK = SUBLANES * LANES      # 1024 elements; kernel rows are a multiple of 8
CHUNK_ROWS = 64                   # (64, 128) f32 chunk = 8 vregs per temporary
MAX_TILE_ROWS = 2048              # (2048, 128) f32 block = 1 MiB / input / buffer
MIN_SPLIT_ROWS = 512              # split into >=2 blocks once each half >= 256 KiB f32
ROW_BLOCK_ALIGN = 64              # keeps non-full blocks sublane-tile aligned (f32/bf16/int8)


def _round_up(x, m):
    return ((x + m - 1) // m) * m


def _focal_kernel(p_ref, t_ref, out_ref, *, alpha, gamma, tile_rows, valid_rows_last):
    n_full = tile_rows // CHUNK_ROWS
    rem_rows = tile_rows - n_full * CHUNK_ROWS

    def chunk_partial(r0, rows, masked):
        x = p_ref[pl.ds(r0, rows), :].astype(jnp.float32)
        t = t_ref[pl.ds(r0, rows), :].astype(jnp.float32)
        # Numerically-stable BCE with logits (== F.binary_cross_entropy_with_logits):
        #   bce = max(x, 0) - x*t + log1p(exp(-|x|))
        z = jnp.exp(-jnp.abs(x))
        bce = jnp.maximum(x, 0.0) - x * t + jnp.log1p(z)
        pt = jnp.exp(-bce)
        q = 1.0 - pt
        # (1 - pt) ** gamma as a multiply chain for small integer gamma
        # (avoids jnp.power = extra log+exp pushes on the single EUP slot).
        if float(gamma).is_integer() and 0 <= int(gamma) <= 4:
            gi = int(gamma)
            w = jnp.ones_like(q) if gi == 0 else q
            for _ in range(max(gi - 1, 0)):
                w = w * q
        else:
            w = jnp.power(q, gamma)
        focal = (alpha * bce) * w
        if masked:
            # Select (not multiply) so garbage rows past the logical array end
            # never propagate NaN/Inf into the partial sum.
            row_ids = jax.lax.broadcasted_iota(jnp.int32, focal.shape, 0) + r0
            focal = jnp.where(row_ids < valid_rows_last, focal, 0.0)
        # Fold the chunk down to one (8, 128) vreg: pure VALU adds, no cross-lane work.
        return focal.reshape(rows // SUBLANES, SUBLANES, LANES).sum(axis=0)

    def tile_partial(masked):
        acc = jnp.zeros((SUBLANES, LANES), jnp.float32)
        if n_full > 0:
            def step(c, a):
                r0 = pl.multiple_of(c * CHUNK_ROWS, CHUNK_ROWS)
                return a + chunk_partial(r0, CHUNK_ROWS, masked)
            acc = jax.lax.fori_loop(0, n_full, step, acc, unroll=True)
        if rem_rows:
            acc = acc + chunk_partial(n_full * CHUNK_ROWS, rem_rows, masked)
        return acc

    if valid_rows_last == tile_rows:
        # Every block is exactly full: no masking anywhere.
        out_ref[...] = tile_partial(masked=False)
    else:
        i = pl.program_id(0)
        last = pl.num_programs(0) - 1

        @pl.when(i != last)
        def _():
            out_ref[...] = tile_partial(masked=False)

        @pl.when(i == last)
        def _():
            out_ref[...] = tile_partial(masked=True)


def _focal_elementwise(x, t, alpha, gamma):
    x = x.astype(jnp.float32)
    t = t.astype(jnp.float32)
    bce = jnp.maximum(x, 0.0) - x * t + jnp.log1p(jnp.exp(-jnp.abs(x)))
    pt = jnp.exp(-bce)
    return alpha * (1.0 - pt) ** gamma * bce


def focal_loss(preds, targets, alpha=0.25, gamma=2.0, reduction="mean"):
    assert preds.shape == targets.shape
    n_total = math.prod(preds.shape)
    alpha = float(alpha)
    gamma = float(gamma)

    p_flat = preds.reshape(-1)
    t_flat = targets.reshape(-1)

    # The kernel handles the largest multiple of 8*128 elements (so the flat
    # array reshapes to (rows, 128) with rows % 8 == 0 at zero cost).  The
    # < 1024-element remainder is summed in plain JAX -- no full-array jnp.pad.
    n_main = (n_total // MIN_BLOCK) * MIN_BLOCK

    tail_total = jnp.float32(0.0)
    if n_main < n_total:
        p_tail = jax.lax.slice(p_flat, (n_main,), (n_total,))
        t_tail = jax.lax.slice(t_flat, (n_main,), (n_total,))
        tail_total = jnp.sum(_focal_elementwise(p_tail, t_tail, alpha, gamma))

    if n_main == 0:
        total = tail_total
    else:
        if n_main < n_total:
            # NOTE: only for sizes not a multiple of 1024 -- this prefix slice
            # may materialize one copy of the main part (producers can't fuse
            # into pallas_call inputs); aligned sizes take the zero-copy path.
            p_flat = jax.lax.slice(p_flat, (0,), (n_main,))
            t_flat = jax.lax.slice(t_flat, (0,), (n_main,))

        n_rows = n_main // LANES                       # always a multiple of 8
        p2 = p_flat.reshape(n_rows, LANES)
        t2 = t_flat.reshape(n_rows, LANES)

        if n_rows > MAX_TILE_ROWS:
            tile_rows = MAX_TILE_ROWS
        elif n_rows >= 2 * MIN_SPLIT_ROWS:
            # Split medium inputs into >= 2 blocks so both TensorCores stream on
            # dual-TC chips (v7x); on single-TC chips the extra step costs ~0.35 us.
            tile_rows = _round_up(pl.cdiv(n_rows, 2), ROW_BLOCK_ALIGN)
        else:
            tile_rows = n_rows                         # single block = full extent
        grid_size = pl.cdiv(n_rows, tile_rows)
        valid_rows_last = n_rows - (grid_size - 1) * tile_rows

        kernel = functools.partial(
            _focal_kernel,
            alpha=alpha,
            gamma=gamma,
            tile_rows=tile_rows,
            valid_rows_last=valid_rows_last,
        )

        in_bytes = p2.size * p2.dtype.itemsize + t2.size * t2.dtype.itemsize
        out_bytes = grid_size * SUBLANES * LANES * 4
        cost = pl.CostEstimate(
            flops=15 * n_main,
            transcendentals=3 * n_main,                # exp, log1p, exp per element
            bytes_accessed=in_bytes + out_bytes,
        )

        partials = pl.pallas_call(
            kernel,
            out_shape=jax.ShapeDtypeStruct((grid_size * SUBLANES, LANES), jnp.float32),
            grid_spec=pltpu.PrefetchScalarGridSpec(
                num_scalar_prefetch=0,
                grid=(grid_size,),
                in_specs=[
                    pl.BlockSpec((tile_rows, LANES), lambda i: (i, 0)),
                    pl.BlockSpec((tile_rows, LANES), lambda i: (i, 0)),
                ],
                out_specs=pl.BlockSpec((SUBLANES, LANES), lambda i: (i, 0)),
            ),
            compiler_params=pltpu.CompilerParams(
                # Independent per-block partial sums -> fully parallel grid.
                dimension_semantics=("parallel",),
                # 2 inputs x 2 buffers x <=1 MiB + tiny output: comfortably under
                # this cap on every generation (v5e scoped default is 16 MiB).
                vmem_limit_bytes=32 * 1024 * 1024,
            ),
            cost_estimate=cost,
        )(p2, t2)

        # Final cross-lane reduce (tiny) + tail done in the wrapper.
        total = jnp.sum(partials) + tail_total

    if reduction == "mean":
        return total / jnp.float32(n_total)
    return total


def focal_loss_ref(preds, targets, alpha=0.25, gamma=2.0, reduction="mean"):
    fl = _focal_elementwise(preds, targets, float(alpha), float(gamma))
    return fl.mean() if reduction == "mean" else fl.sum()


if __name__ == "__main__":
    key = jax.random.PRNGKey(0)
    k1, k2, k3, k4, k5, k6, k7, k8, k9, k10 = jax.random.split(key, 10)

    # 1) Main case, shaped like the PyTorch module's typical input.
    preds = jax.random.normal(k1, (2, 4, 16, 16), dtype=jnp.float32)
    targets = (jax.random.uniform(k2, (2, 4, 16, 16)) > 0.5).astype(jnp.float32)
    out = jax.block_until_ready(
        focal_loss(preds, targets, alpha=0.25, gamma=2.0, reduction="mean"))
    ref = focal_loss_ref(preds, targets)
    assert jnp.allclose(out, ref, rtol=1e-5, atol=1e-6), (out, ref)

    # 2) Lane-unaligned size (small plain-JAX tail path), sum reduction.
    p2 = jax.random.normal(k3, (2, 3, 20, 20), dtype=jnp.float32)
    t2 = (jax.random.uniform(k4, (2, 3, 20, 20)) > 0.5).astype(jnp.float32)
    out2 = jax.block_until_ready(focal_loss(p2, t2, reduction="sum"))
    ref2 = focal_loss_ref(p2, t2, reduction="sum")
    assert jnp.allclose(out2, ref2, rtol=1e-4, atol=1e-4), (out2, ref2)

    # 3) Multi-block grid with a ragged (masked) last block, split across 2 blocks.
    p3 = jax.random.normal(k5, (1, 4, 192, 200), dtype=jnp.float32)
    t3 = (jax.random.uniform(k6, (1, 4, 192, 200)) > 0.5).astype(jnp.float32)
    out3 = jax.block_until_ready(focal_loss(p3, t3))
    ref3 = focal_loss_ref(p3, t3)
    assert jnp.allclose(out3, ref3, rtol=1e-4, atol=1e-6), (out3, ref3)

    # 4) Narrow input dtypes passed straight through (bf16 logits, int8 targets).
    p4 = jax.random.normal(k7, (2, 4, 16, 32), dtype=jnp.bfloat16)
    t4 = (jax.random.uniform(k8, (2, 4, 16, 32)) > 0.5).astype(jnp.int8)
    out4 = jax.block_until_ready(focal_loss(p4, t4))
    ref4 = focal_loss_ref(p4.astype(jnp.float32), t4.astype(jnp.float32))
    assert jnp.allclose(out4, ref4, rtol=1e-5, atol=1e-6), (out4, ref4)

    # 5) Large enough to use the full (2048, 128) block and the 32-chunk inner loop.
    p5 = jax.random.normal(k9, (2, 8, 144, 144), dtype=jnp.float32)
    t5 = (jax.random.uniform(k10, (2, 8, 144, 144)) > 0.5).astype(jnp.float32)
    out5 = jax.block_until_ready(focal_loss(p5, t5))
    ref5 = focal_loss_ref(p5, t5)
    assert jnp.allclose(out5, ref5, rtol=1e-4, atol=1e-6), (out5, ref5)

    print("KERNEL_OK")
</pallas_src>

<mosaic_0001>
module attributes {stable_mosaic.version = 11 : i64} {
  func.func @_focal_kernel(%arg0: i32, %arg1: memref<16x128xf32, #tpu.memory_space<vmem>>, %arg2: memref<16x128xf32, #tpu.memory_space<vmem>>, %arg3: memref<8x128xf32, #tpu.memory_space<vmem>>) attributes {dimension_semantics = [#tpu.dimension_semantics<parallel>], iteration_bounds = array<i64: 1>, scalar_prefetch = 0 : i64, scratch_operands = 0 : i64, tpu.core_type = #tpu.core_type<tc>, window_params = [{transform_indices = @transform_0, window_bounds = array<i64: 16, 128>}, {transform_indices = @transform_1, window_bounds = array<i64: 16, 128>}, {transform_indices = @transform_2, window_bounds = array<i64: 8, 128>}]} {
    %cst = arith.constant 0.000000e+00 : f32
    %0 = vector.broadcast %cst : f32 to vector<8x128xf32>
    %c0 = arith.constant 0 : index
    %c0_0 = arith.constant 0 : index
    %1 = vector.load %arg1[%c0, %c0_0] : memref<16x128xf32, #tpu.memory_space<vmem>>, vector<16x128xf32>
    %c0_1 = arith.constant 0 : index
    %c0_2 = arith.constant 0 : index
    %2 = vector.load %arg2[%c0_1, %c0_2] : memref<16x128xf32, #tpu.memory_space<vmem>>, vector<16x128xf32>
    %3 = math.absf %1 : vector<16x128xf32>
    %cst_3 = arith.constant 0.000000e+00 : f32
    %4 = vector.broadcast %cst_3 : f32 to vector<16x128xf32>
    %5 = arith.subf %4, %3 : vector<16x128xf32>
    %6 = math.exp %5 : vector<16x128xf32>
    %cst_4 = arith.constant 0.000000e+00 : f32
    %7 = vector.broadcast %cst_4 : f32 to vector<16x128xf32>
    %8 = arith.maximumf %1, %7 : vector<16x128xf32>
    %9 = arith.mulf %1, %2 : vector<16x128xf32>
    %10 = arith.subf %8, %9 : vector<16x128xf32>
    %11 = math.log1p %6 : vector<16x128xf32>
    %12 = arith.addf %10, %11 : vector<16x128xf32>
    %cst_5 = arith.constant 0.000000e+00 : f32
    %13 = vector.broadcast %cst_5 : f32 to vector<16x128xf32>
    %14 = arith.subf %13, %12 : vector<16x128xf32>
    %15 = math.exp %14 : vector<16x128xf32>
    %cst_6 = arith.constant 1.000000e+00 : f32
    %16 = vector.broadcast %cst_6 : f32 to vector<16x128xf32>
    %17 = arith.subf %16, %15 : vector<16x128xf32>
    %18 = arith.mulf %17, %17 : vector<16x128xf32>
    %cst_7 = arith.constant 2.500000e-01 : f32
    %19 = vector.broadcast %cst_7 : f32 to vector<16x128xf32>
    %20 = arith.mulf %19, %12 : vector<16x128xf32>
    %21 = arith.mulf %20, %18 : vector<16x128xf32>
    %22 = vector.shape_cast %21 : vector<16x128xf32> to vector<2x8x128xf32>
    %cst_8 = arith.constant dense<0.000000e+00> : vector<8x128xf32>
    %23 = vector.multi_reduction <add>, %22, %cst_8 [0] : vector<2x8x128xf32> to vector<8x128xf32>
    %24 = arith.addf %0, %23 : vector<8x128xf32>
    %c0_9 = arith.constant 0 : index
    %c0_10 = arith.constant 0 : index
    %25 = vector.load %arg3[%c0_9, %c0_10] : memref<8x128xf32, #tpu.memory_space<vmem>>, vector<8x128xf32>
    tpu.vector_store %arg3[%c0_9, %c0_10], %24 {strides = array<i32>} : memref<8x128xf32, #tpu.memory_space<vmem>>, vector<8x128xf32>,
    return
  }
  func.func @transform_0(%arg0: i32) -> (i32, i32) {
    %c0_i32 = arith.constant 0 : i32
    %c0_i32_0 = arith.constant 0 : i32
    return %arg0, %c0_i32 : i32, i32
  }
  func.func @transform_1(%arg0: i32) -> (i32, i32) {
    %c0_i32 = arith.constant 0 : i32
    %c0_i32_0 = arith.constant 0 : i32
    return %arg0, %c0_i32 : i32, i32
  }
  func.func @transform_2(%arg0: i32) -> (i32, i32) {
    %c0_i32 = arith.constant 0 : i32
    %c0_i32_0 = arith.constant 0 : i32
    return %arg0, %c0_i32 : i32, i32
  }
}

</mosaic_0001>

<bundles_post_ra>
// kernel: tpu_custom_call.1
= control target key start
LH: loop header
LB: loop body
LE: loop exit
PB: predicated region body
PF: predicated region fallthrough
CT: control target
= control target key end

     0   :  { %7 = vsyncpa [#allocation3], 0  ;;  %s256_s0 = inlined_call_operand.hbm [shape: f32[16,128], index: 0, kind: input, shape index: {}]   ;;  %s257_s1 = inlined_call_operand.hbm [shape: f32[16,128], index: 1, kind: input, shape index: {}]   ;;  %s258_s2 = inlined_call_operand.hbm [shape: f32[8,128], index: 2, kind: output, shape index: {}]  }
   0x1   :  { %8 = vsyncpa [#allocation6], 0 }
   0x2   :  { %9 = vsyncpa [#allocation4], 0  ;;  %s200_s9 = smov [#allocation2]   ;;  %s128_s13 = scalar_lea.hbm %s256_s0, 256 }
   0x3   :  { %s15_s10 = sshll.u32 %s200_s9, 4  ;;  %p129_p0 = scmp.ne.s32.totalorder %s256_s0, %s128_s13  ;;  %s16_s10 = int_to_ptr.vmem [resolvable:$true] %s15_s10 }
   0x4   :  { %p132_p1 = scmp.lt.u32.totalorder %s128_s13, %s256_s0 }
   0x6   :  { %p134_p2 = pnand %p132_p1, %p129_p0 }
   0x8   :  { %137 = shalt.err (!%p134_p2)
}
   0x9   :  { %s138_s18 = scalar_lea.vmem %s16_s10, 256  ;;  %p143_p4 = scmp.lt.s32.totalorder %s16_s10, %s16_s10 }
   0xa   :  { %p139_p3 = scmp.ne.s32.totalorder %s16_s10, %s138_s18  ;;  %p144_p5 = scmp.lt.s32.totalorder %s138_s18, %s138_s18 }
   0xc   :  { %p145_p6 = por %p144_p5, %p143_p4 }
   0xe   :  { %p146_p7 = pnand %p145_p6, %p139_p3 }
  0x10   :  { %149 = shalt.err (!%p146_p7)
}
  0x11   :  { %s201_s19 = smov 128   ;;  %s202_s20 = smov 8  }
  0x12   :  { %21 = dma.hbm_to_vmem [thread:$0]  %s256_s0, 256, %s16_s10, [#allocation3], %s201_s19, %s201_s19, %s202_s20  }
  0x13   :  { %s203_s23 = smov [#allocation5]   ;;  %s150_s27 = scalar_lea.hbm %s257_s1, 256 }
  0x14   :  { %s27_s24 = sshll.u32 %s203_s23, 4  ;;  %p151_p8 = scmp.ne.s32.totalorder %s257_s1, %s150_s27  ;;  %s28_s24 = int_to_ptr.vmem [resolvable:$true] %s27_s24 }
  0x15   :  { %p154_p9 = scmp.lt.u32.totalorder %s150_s27, %s257_s1 }
  0x17   :  { %p156_p10 = pnand %p154_p9, %p151_p8 }
  0x19   :  { %159 = shalt.err (!%p156_p10)
}
  0x1a   :  { %s160_s4 = scalar_lea.vmem %s28_s24, 256  ;;  %p165_p12 = scmp.lt.s32.totalorder %s28_s24, %s28_s24 }
  0x1b   :  { %p161_p11 = scmp.ne.s32.totalorder %s28_s24, %s160_s4  ;;  %p166_p13 = scmp.lt.s32.totalorder %s160_s4, %s160_s4 }
  0x1d   :  { %p167_p0 = por %p166_p13, %p165_p12 }
  0x1f   :  { %p168_p1 = pnand %p167_p0, %p161_p11 }
  0x21   :  { %171 = shalt.err (!%p168_p1)
}
  0x22   :  { %33 = dma.hbm_to_vmem [thread:$0]  %s257_s1, 256, %s28_s24, [#allocation6], %s201_s19, %s201_s19, %s202_s20  }
  0x23   :  { %194 = dma.done.wait [#allocation3], 256  }
  0x24   :  { %195 = vsyncadd [#allocation3], 4294967040 }
  0x25   :  { %196 = dma.done.wait [#allocation6], 256  }
  0x26   :  { %197 = vsyncadd [#allocation6], 4294967040  ;;  %v40_v0 = vld [vmem:[#allocation2] sm:$0xff]  ;;  %v41_v1 = vld [vmem:[#allocation2 + $0x8] sm:$0xff]  ;;  %s204_s1 = smov [#allocation7]  }
  0x27   :  { %v44_v2 = vand.u32 2147483647, %v40_v0  ;;  %v45_v3 = vand.u32 2147483647, %v41_v1  ;;  %v42_v14 = vld [vmem:[#allocation5] sm:$0xff]  ;;  %v43_v15 = vld [vmem:[#allocation5 + $0x8] sm:$0xff] }
  0x28   :  { %v52_v17 = vmax.f32 %v40_v0, 0.0  ;;  %v54_v18 = vmul.f32 %v42_v14, %v40_v0  ;;  %v53_v21 = vmax.f32 %v41_v1, 0.0  ;;  %v55_v22 = vmul.f32 %v43_v15, %v41_v1  ;;  %s101_s6 = sshll.u32 %s204_s1, 4  ;;  %s102_s6 = int_to_ptr.vmem [resolvable:$true] %s101_s6 }
  0x29   :  { %v46_v4 = vsub.f32 0.0, %v44_v2  ;;  %v47_v5 = vsub.f32 0.0, %v45_v3  ;;  %s172_s7 = scalar_lea.vmem %s102_s6, 128  ;;  %p177_p3 = scmp.lt.s32.totalorder %s102_s6, %s102_s6 }
  0x2a   :  { %v56_v26 = vsub.f32 %v52_v17, %v54_v18  ;;  %v57_v29 = vsub.f32 %v53_v21, %v55_v22  ;;  %p173_p2 = scmp.ne.s32.totalorder %s102_s6, %s172_s7  ;;  %p178_p4 = scmp.lt.s32.totalorder %s172_s7, %s172_s7 }
  0x2b   :  { %v48_v6 = vmul.f32 1.442695, %v46_v4  ;;  %v50_v7 = vmul.f32 1.442695, %v47_v5 }
  0x2c   :  { %p179_p5 = por %p178_p4, %p177_p3 }
  0x2d   :  { %116 = vpow2.f32 %v48_v6 }
  0x2e   :  { %118 = vpow2.f32 %v50_v7  ;;  %p180_p6 = pnand %p179_p5, %p173_p2 }
  0x37   :  { %v117_v8 = vpop.eup %116 }
  0x38   :  { %v119_v9 = vpop.eup %118  ;;  %v58_v10 = vadd.f32 1.0, %v117_v8  ;;  %v61_v12 = vmul.f32 -0.5, %v117_v8  ;;  %v64_v19 = vand.u32 2147483647, %v117_v8 }
  0x39   :  { %v67_v11 = vadd.f32 1.0, %v119_v9  ;;  %v70_v13 = vmul.f32 -0.5, %v119_v9  ;;  %v73_v23 = vand.u32 2147483647, %v119_v9 }
  0x3a   :  { %120 = vlog2.f32 %v58_v10  ;;  %v62_v16 = vadd.f32 1.0, %v61_v12  ;;  %vm65_vm0 = vcmp.lt.f32.partialorder %v64_v19, 0.0004427343 }
  0x3b   :  { %122 = vlog2.f32 %v67_v11  ;;  %v71_v20 = vadd.f32 1.0, %v70_v13  ;;  %vm74_vm1 = vcmp.lt.f32.partialorder %v73_v23, 0.0004427343 }
  0x3c   :  { %v63_v24 = vmul.f32 %v117_v8, %v62_v16 }
  0x3d   :  { %v72_v27 = vmul.f32 %v119_v9, %v71_v20 }
  0x44   :  { %v121_v25 = vpop.eup %120 }
  0x45   :  { %v123_v28 = vpop.eup %122  ;;  %v60_v30 = vmul.f32 0.6931472, %v121_v25 }
  0x46   :  { %v69_v31 = vmul.f32 0.6931472, %v123_v28 }
  0x47   :  { %v66_v32 = vsel %vm65_vm0, %v63_v24, %v60_v30 }
  0x48   :  { %v75_v33 = vsel %vm74_vm1, %v72_v27, %v69_v31  ;;  %v76_v34 = vadd.f32 %v66_v32, %v56_v26 }
  0x49   :  { %v77_v35 = vadd.f32 %v75_v33, %v57_v29 }
  0x4a   :  { %v78_v36 = vsub.f32 0.0, %v76_v34  ;;  %v88_v43 = vmul.f32 0.25, %v76_v34 }
  0x4b   :  { %v79_v37 = vsub.f32 0.0, %v77_v35  ;;  %v89_v45 = vmul.f32 0.25, %v77_v35 }
  0x4c   :  { %v80_v38 = vmul.f32 1.442695, %v78_v36 }
  0x4d   :  { %v82_v39 = vmul.f32 1.442695, %v79_v37 }
  0x4e   :  { %124 = vpow2.f32 %v80_v38 }
  0x4f   :  { %126 = vpow2.f32 %v82_v39 }
  0x58   :  { %v125_v40 = vpop.eup %124 }
  0x59   :  { %v127_v41 = vpop.eup %126  ;;  %v84_v42 = vsub.f32 1.0, %v125_v40 }
  0x5a   :  { %v85_v44 = vsub.f32 1.0, %v127_v41 }
  0x5b   :  { %v86_v46 = vmul.f32 %v84_v42, %v84_v42 }
  0x5c   :  { %v87_v47 = vmul.f32 %v85_v44, %v85_v44 }
  0x5d   :  { %v90_v48 = vmul.f32 %v88_v43, %v86_v46 }
  0x5e   :  { %v91_v49 = vmul.f32 %v89_v45, %v87_v47 }
  0x60   :  { %v92_v50 = vadd.f32 %v91_v49, %v90_v48 }
  0x62   :  { %94 = vst [vmem:[#allocation7] sm:$0xff] %v92_v50 }
  0x63   :  { %183 = shalt.err (!%p180_p6)
}
  0x64   :  { %s184_s10 = scalar_lea.hbm %s258_s2, 128 }
  0x65   :  { %p185_p7 = scmp.ne.s32.totalorder %s258_s2, %s184_s10  ;;  %p188_p8 = scmp.lt.u32.totalorder %s184_s10, %s258_s2 }
  0x67   :  { %p190_p9 = pnand %p188_p8, %p185_p7 }
  0x69   :  { %193 = shalt.err (!%p190_p9)
}
  0x6a   :  { %104 = dma.vmem_to_hbm [thread:$0]  %s102_s6, 128, %s258_s2, [#allocation4]  }
  0x6b   :  { %198 = dma.done.wait [#allocation4], 128  }
  0x6c   :  { %199 = vsyncadd [#allocation4], 4294967168 }
  0x6d   :  { %108 = vsyncpa [#allocation3], 1 }
  0x6e   :  { %109 = vsyncpa [#allocation6], 1 }
  0x6f   :  { %110 = vsyncpa [#allocation4], 1 }

</bundles_post_ra>
